<compile_context>
chip_gen: v7x
topology: tpu7x:2x2x1
jax: 0.10.0
libtpu: 0.0.40
codegen_flags: <defaults>
</compile_context>

<pallas_src>
import jax
import jax.numpy as jnp
from jax.experimental import pallas as pl
from jax.experimental.pallas import tpu as pltpu


def _round_up(x, m):
    return ((x + m - 1) // m) * m


def _mlp_kernel(x_ref, w1_ref, b1_ref, w2_ref, b2_ref, w3_ref, b3_ref, o_ref):
    """Fused 3-layer MLP: (matmul+bias+ReLU) x2 then matmul+bias.

    x arrives in f32 and is cast to the weights' compute dtype in-kernel (a
    cheap VPU pack), so the wrapper never rewrites the input array in HBM.
    Accumulation is always f32."""
    cdt = w1_ref.dtype
    x = x_ref[...].astype(cdt)
    h1 = jnp.dot(x, w1_ref[...], preferred_element_type=jnp.float32) + b1_ref[...]
    h1 = jnp.maximum(h1, 0.0)
    h2 = jnp.dot(h1.astype(cdt), w2_ref[...],
                 preferred_element_type=jnp.float32) + b2_ref[...]
    h2 = jnp.maximum(h2, 0.0)
    out = jnp.dot(h2.astype(cdt), w3_ref[...],
                  preferred_element_type=jnp.float32) + b3_ref[...]
    o_ref[...] = out.astype(o_ref.dtype)


def response_aggregator_forward(x, params, *, tile_b=None,
                                compute_dtype=jnp.bfloat16):
    """x: (B, in_feats) float32.  params: (in,out) weights + (1,out) biases.

    Returns (B, num_class) float32 logits.

    NOTE: with the default compute_dtype=bfloat16 the matmul operands are
    cast to bf16 (f32 accumulation), which diverges from an f32 PyTorch
    Response_Aggregator by roughly bf16 rounding error; use
    compute_dtype=jnp.float32 for an exact-precision path."""
    B, in_feats = x.shape
    w1, b1 = params["w1"], params["b1"]
    w2, b2 = params["w2"], params["b2"]
    w3, b3 = params["w3"], params["b3"]
    W = w1.shape[1]
    Wh = w2.shape[1]
    num_class = w3.shape[1]

    # Weights/biases are tiny and read once per call: casting them in the
    # wrapper is negligible HBM traffic.  The (large) activations x stay f32.
    w1c, w2c, w3c = (w.astype(compute_dtype) for w in (w1, w2, w3))
    b1f, b2f, b3f = (b.astype(jnp.float32) for b in (b1, b2, b3))
    x_in = x.astype(jnp.float32)

    # --- batch tiling: real grid so x/out DMA overlaps compute.
    if tile_b is None:
        # 1024 rows amortizes per-step overhead (~0.35us) and keeps the
        # per-step VMEM footprint at a few MiB even for W=256 / in_feats=256,
        # comfortably inside v5e/v6e/v7x scoped-VMEM defaults.
        tile_b = min(1024, _round_up(B, 8))
    tile_b = max(8, _round_up(tile_b, 8))

    grid_b = pl.cdiv(B, tile_b)          # no even-grid padding hack
    B_pad = grid_b * tile_b
    if B_pad != B:
        x_in = jnp.pad(x_in, ((0, B_pad - B), (0, 0)))

    weight_spec = lambda shape: pl.BlockSpec(shape, lambda i: (0, 0))

    flops = 2 * B_pad * (in_feats * W + W * Wh + Wh * num_class)
    bytes_accessed = (
        B_pad * in_feats * 4                      # x read (f32)
        + B_pad * num_class * 4                   # out write (f32, true width)
        + sum(int(a.size) * a.dtype.itemsize
              for a in (w1c, w2c, w3c, b1f, b2f, b3f))
    )

    out_padded = pl.pallas_call(
        _mlp_kernel,
        out_shape=jax.ShapeDtypeStruct((B_pad, num_class), jnp.float32),
        grid=(grid_b,),
        in_specs=[
            pl.BlockSpec((tile_b, in_feats), lambda i: (i, 0)),
            weight_spec(w1c.shape),
            weight_spec(b1f.shape),
            weight_spec(w2c.shape),
            weight_spec(b2f.shape),
            weight_spec(w3c.shape),   # (Wh, num_class): last dim == full dim, legal
            weight_spec(b3f.shape),
        ],
        # True-width output block (last dim == full array dim).  For small
        # num_class this trades masked vst for ~8x fewer output HBM bytes and
        # removes the post-kernel column slice -> net win for a mem-bound MLP.
        out_specs=pl.BlockSpec((tile_b, num_class), lambda i: (i, 0)),
        compiler_params=pltpu.CompilerParams(
            dimension_semantics=("parallel",),
        ),
        cost_estimate=pl.CostEstimate(
            flops=flops, transcendentals=0, bytes_accessed=bytes_accessed),
    )(x_in, w1c, b1f, w2c, b2f, w3c, b3f)

    # Only slice (extra HBM pass) when the batch actually needed padding.
    return out_padded if B_pad == B else out_padded[:B]


def init_params(key, num_class, W=256, input_class=None, dtype=jnp.float32):
    """Deterministic synthetic init mirroring the module's parameter shapes.

    PyTorch Linear weights are (out, in); we store them as (in, out)."""
    in_feats = input_class if input_class is not None else num_class
    ks = jax.random.split(key, 6)

    def lin(kw, kb, fin, fout):
        w = (jax.random.normal(kw, (fin, fout), dtype) / jnp.sqrt(fin)).astype(dtype)
        b = (jax.random.normal(kb, (1, fout), dtype) * 0.01).astype(dtype)
        return w, b

    w1, b1 = lin(ks[0], ks[1], in_feats, W)
    w2, b2 = lin(ks[2], ks[3], W, W // 2)
    w3, b3 = lin(ks[4], ks[5], W // 2, num_class)
    return {"w1": w1, "b1": b1, "w2": w2, "b2": b2, "w3": w3, "b3": b3}


def _reference_forward(x, p, compute_dtype=jnp.bfloat16):
    """Pure-JAX reference applying the same operand casts as the kernel."""
    cdt = compute_dtype
    xw = x.astype(cdt)
    w1, w2, w3 = (p[k].astype(cdt) for k in ("w1", "w2", "w3"))
    b1, b2, b3 = (p[k].astype(jnp.float32) for k in ("b1", "b2", "b3"))
    h = jnp.maximum(jnp.dot(xw, w1, preferred_element_type=jnp.float32) + b1, 0.0)
    h = jnp.maximum(jnp.dot(h.astype(cdt), w2,
                            preferred_element_type=jnp.float32) + b2, 0.0)
    return jnp.dot(h.astype(cdt), w3, preferred_element_type=jnp.float32) + b3


if __name__ == "__main__":
    # Small shapes consistent with the module: input_class is None so input
    # features == num_class.  Batch/tile chosen to exercise a multi-step grid
    # (grid_b=3), the batch-padding path and the narrow (num_class<128) output
    # block.
    num_class = 16
    W = 32
    batch = 40
    tile_b = 16

    key = jax.random.PRNGKey(0)
    k_x, k_p = jax.random.split(key)
    x = jax.random.normal(k_x, (batch, num_class), jnp.float32)
    params = init_params(k_p, num_class=num_class, W=W, input_class=None)

    out = response_aggregator_forward(x, params, tile_b=tile_b)
    out = jax.block_until_ready(out)

    ref = _reference_forward(x, params)
    assert out.shape == (batch, num_class)
    assert jnp.allclose(out, ref, atol=2e-3, rtol=2e-3), "mismatch vs reference"

    # Also exercise the exact-f32 path (matches an f32 PyTorch module's math).
    out_f32 = jax.block_until_ready(
        response_aggregator_forward(x, params, tile_b=tile_b,
                                    compute_dtype=jnp.float32))
    ref_f32 = _reference_forward(x, params, compute_dtype=jnp.float32)
    assert jnp.allclose(out_f32, ref_f32, atol=1e-5, rtol=1e-5), "f32 mismatch"

    print("KERNEL_OK")
</pallas_src>

<mosaic_0001>
module attributes {stable_mosaic.version = 11 : i64} {
  func.func @_mlp_kernel(%arg0: i32, %arg1: memref<16x16xf32, #tpu.memory_space<vmem>>, %arg2: memref<16x32xbf16, #tpu.memory_space<vmem>>, %arg3: memref<1x32xf32, #tpu.memory_space<vmem>>, %arg4: memref<32x16xbf16, #tpu.memory_space<vmem>>, %arg5: memref<1x16xf32, #tpu.memory_space<vmem>>, %arg6: memref<16x16xbf16, #tpu.memory_space<vmem>>, %arg7: memref<1x16xf32, #tpu.memory_space<vmem>>, %arg8: memref<16x16xf32, #tpu.memory_space<vmem>>) attributes {dimension_semantics = [#tpu.dimension_semantics<parallel>], iteration_bounds = array<i64: 3>, scalar_prefetch = 0 : i64, scratch_operands = 0 : i64, tpu.core_type = #tpu.core_type<tc>, window_params = [{transform_indices = @transform_0, window_bounds = array<i64: 16, 16>}, {pipeline_mode = #tpu.pipeline_mode<synchronous>, transform_indices = @transform_1, window_bounds = array<i64: 16, 32>}, {pipeline_mode = #tpu.pipeline_mode<synchronous>, transform_indices = @transform_2, window_bounds = array<i64: 1, 32>}, {pipeline_mode = #tpu.pipeline_mode<synchronous>, transform_indices = @transform_3, window_bounds = array<i64: 32, 16>}, {pipeline_mode = #tpu.pipeline_mode<synchronous>, transform_indices = @transform_4, window_bounds = array<i64: 1, 16>}, {pipeline_mode = #tpu.pipeline_mode<synchronous>, transform_indices = @transform_5, window_bounds = array<i64: 16, 16>}, {pipeline_mode = #tpu.pipeline_mode<synchronous>, transform_indices = @transform_6, window_bounds = array<i64: 1, 16>}, {transform_indices = @transform_7, window_bounds = array<i64: 16, 16>}]} {
    %c0 = arith.constant 0 : index
    %c0_0 = arith.constant 0 : index
    %0 = vector.load %arg1[%c0, %c0_0] : memref<16x16xf32, #tpu.memory_space<vmem>>, vector<16x16xf32>
    %1 = arith.truncf %0 : vector<16x16xf32> to vector<16x16xbf16>
    %c0_1 = arith.constant 0 : index
    %c0_2 = arith.constant 0 : index
    %2 = vector.load %arg2[%c0_1, %c0_2] : memref<16x32xbf16, #tpu.memory_space<vmem>>, vector<16x32xbf16>
    %cst = arith.constant dense<0.000000e+00> : vector<16x32xf32>
    %3 = tpu.matmul %1, %2, %cst {dimension_numbers = #tpu.dot_dimension_numbers<[1], [0], [0], [1], [0, 0, 1, 1], [], []>} : vector<16x16xbf16>, vector<16x32xbf16>, vector<16x32xf32> -> vector<16x32xf32>
    %c0_3 = arith.constant 0 : index
    %c0_4 = arith.constant 0 : index
    %4 = vector.load %arg3[%c0_3, %c0_4] : memref<1x32xf32, #tpu.memory_space<vmem>>, vector<1x32xf32>
    %5 = vector.broadcast %4 : vector<1x32xf32> to vector<16x32xf32>
    %6 = arith.addf %3, %5 : vector<16x32xf32>
    %cst_5 = arith.constant 0.000000e+00 : f32
    %7 = vector.broadcast %cst_5 : f32 to vector<16x32xf32>
    %8 = arith.maximumf %6, %7 : vector<16x32xf32>
    %9 = arith.truncf %8 : vector<16x32xf32> to vector<16x32xbf16>
    %c0_6 = arith.constant 0 : index
    %c0_7 = arith.constant 0 : index
    %10 = vector.load %arg4[%c0_6, %c0_7] : memref<32x16xbf16, #tpu.memory_space<vmem>>, vector<32x16xbf16>
    %cst_8 = arith.constant dense<0.000000e+00> : vector<16x16xf32>
    %11 = tpu.matmul %9, %10, %cst_8 {dimension_numbers = #tpu.dot_dimension_numbers<[1], [0], [0], [1], [0, 0, 1, 1], [], []>} : vector<16x32xbf16>, vector<32x16xbf16>, vector<16x16xf32> -> vector<16x16xf32>
    %c0_9 = arith.constant 0 : index
    %c0_10 = arith.constant 0 : index
    %12 = vector.load %arg5[%c0_9, %c0_10] : memref<1x16xf32, #tpu.memory_space<vmem>>, vector<1x16xf32>
    %13 = vector.broadcast %12 : vector<1x16xf32> to vector<16x16xf32>
    %14 = arith.addf %11, %13 : vector<16x16xf32>
    %cst_11 = arith.constant 0.000000e+00 : f32
    %15 = vector.broadcast %cst_11 : f32 to vector<16x16xf32>
    %16 = arith.maximumf %14, %15 : vector<16x16xf32>
    %17 = arith.truncf %16 : vector<16x16xf32> to vector<16x16xbf16>
    %c0_12 = arith.constant 0 : index
    %c0_13 = arith.constant 0 : index
    %18 = vector.load %arg6[%c0_12, %c0_13] : memref<16x16xbf16, #tpu.memory_space<vmem>>, vector<16x16xbf16>
    %cst_14 = arith.constant dense<0.000000e+00> : vector<16x16xf32>
    %19 = tpu.matmul %17, %18, %cst_14 {dimension_numbers = #tpu.dot_dimension_numbers<[1], [0], [0], [1], [0, 0, 1, 1], [], []>} : vector<16x16xbf16>, vector<16x16xbf16>, vector<16x16xf32> -> vector<16x16xf32>
    %c0_15 = arith.constant 0 : index
    %c0_16 = arith.constant 0 : index
    %20 = vector.load %arg7[%c0_15, %c0_16] : memref<1x16xf32, #tpu.memory_space<vmem>>, vector<1x16xf32>
    %21 = vector.broadcast %20 : vector<1x16xf32> to vector<16x16xf32>
    %22 = arith.addf %19, %21 : vector<16x16xf32>
    %c0_17 = arith.constant 0 : index
    %c0_18 = arith.constant 0 : index
    %23 = vector.load %arg8[%c0_17, %c0_18] : memref<16x16xf32, #tpu.memory_space<vmem>>, vector<16x16xf32>
    tpu.vector_store %arg8[%c0_17, %c0_18], %22 {strides = array<i32>} : memref<16x16xf32, #tpu.memory_space<vmem>>, vector<16x16xf32>,
    return
  }
  func.func @transform_0(%arg0: i32) -> (i32, i32) {
    %c0_i32 = arith.constant 0 : i32
    %c0_i32_0 = arith.constant 0 : i32
    return %arg0, %c0_i32 : i32, i32
  }
  func.func @transform_1(%arg0: i32) -> (i32, i32) {
    %c0_i32 = arith.constant 0 : i32
    %c0_i32_0 = arith.constant 0 : i32
    %c0_i32_1 = arith.constant 0 : i32
    return %c0_i32, %c0_i32_0 : i32, i32
  }
  func.func @transform_2(%arg0: i32) -> (i32, i32) {
    %c0_i32 = arith.constant 0 : i32
    %c0_i32_0 = arith.constant 0 : i32
    %c0_i32_1 = arith.constant 0 : i32
    return %c0_i32, %c0_i32_0 : i32, i32
  }
  func.func @transform_3(%arg0: i32) -> (i32, i32) {
    %c0_i32 = arith.constant 0 : i32
    %c0_i32_0 = arith.constant 0 : i32
    %c0_i32_1 = arith.constant 0 : i32
    return %c0_i32, %c0_i32_0 : i32, i32
  }
  func.func @transform_4(%arg0: i32) -> (i32, i32) {
    %c0_i32 = arith.constant 0 : i32
    %c0_i32_0 = arith.constant 0 : i32
    %c0_i32_1 = arith.constant 0 : i32
    return %c0_i32, %c0_i32_0 : i32, i32
  }
  func.func @transform_5(%arg0: i32) -> (i32, i32) {
    %c0_i32 = arith.constant 0 : i32
    %c0_i32_0 = arith.constant 0 : i32
    %c0_i32_1 = arith.constant 0 : i32
    return %c0_i32, %c0_i32_0 : i32, i32
  }
  func.func @transform_6(%arg0: i32) -> (i32, i32) {
    %c0_i32 = arith.constant 0 : i32
    %c0_i32_0 = arith.constant 0 : i32
    %c0_i32_1 = arith.constant 0 : i32
    return %c0_i32, %c0_i32_0 : i32, i32
  }
  func.func @transform_7(%arg0: i32) -> (i32, i32) {
    %c0_i32 = arith.constant 0 : i32
    %c0_i32_0 = arith.constant 0 : i32
    return %arg0, %c0_i32 : i32, i32
  }
}

</mosaic_0001>

<bundles_post_ra>
// kernel: tpu_custom_call.1
= control target key start
LH: loop header
LB: loop body
LE: loop exit
PB: predicated region body
PF: predicated region fallthrough
CT: control target
= control target key end

     0   :  { %s649_s24 = smov 0   ;;  %s698_s0 = inlined_call_operand.vmem [shape: f32[48,16], index: 0, kind: input, shape index: {}]   ;;  %s699_s1 = inlined_call_operand.vmem [shape: bf16[16,32], index: 1, kind: input, shape index: {}]   ;;  %s700_s2 = inlined_call_operand.vmem [shape: f32[1,32], index: 2, kind: input, shape index: {}]   ;;  %s701_s3 = inlined_call_operand.vmem [shape: bf16[32,16], index: 3, kind: input, shape index: {}]   ;;  %s702_s4 = inlined_call_operand.vmem [shape: f32[1,16], index: 4, kind: input, shape index: {}]   ;;  %s703_s5 = inlined_call_operand.vmem [shape: bf16[16,16], index: 5, kind: input, shape index: {}]   ;;  %s704_s6 = inlined_call_operand.vmem [shape: f32[1,16], index: 6, kind: input, shape index: {}]   ;;  %s705_s7 = inlined_call_operand.vmem [shape: f32[48,16], index: 7, kind: output, shape index: {}]  }
   0x1 LB: > { %s537_s25 = sadd.s32 4294967295, %s605_s24   ;;  %p541_p0 = scmp.ge.s32.totalorder %s605_s24, 1  ;;  %s605_s24 = sphi %s649_s24, %s17_s24  }
   0x2   : > { %p238_p1 = scmp.lt.s32.totalorder %s605_s24, 4 }
   0x4   : > { %p239_p2 = pnand %p541_p0, %p238_p1 }
   0x5   : > { %v595_v0 = vld [vmem:[%s699_s1] sm:$0xff] (!%p239_p2)   ;;  %v607_v1 = vmov (!%p239_p2), 0.0   ;;  %s542_s28 = sshll.u32 (!%p239_p2), %s537_s25, 1  ;;  %vm608_vm0 = vmmov (!%p239_p2), 0   ;;  %vm301_vm1 = vcmask (!%p239_p2), 130048   ;;  %v597_v6 = vld [vmem:[%s701_s3 + $0x8] sm:$0xff] (!%p239_p2)  }
   0x6   : > { %242 = sbr.rel (%p239_p2) target bundleno = 676 (0x2a4), region = 48  ;;  %565 = vmatprep.subr.bf16.mxu0 (!%p239_p2), %v607_v1  ;;  %571 = vmatprep.subr.bf16.mxu1 (!%p239_p2), %v607_v1  ;;  %p271_p3 = scmp.lt.s32.totalorder (!%p239_p2), %s542_s28, 5  ;;  %v596_v5 = vld [vmem:[%s701_s3] sm:$0xff] (!%p239_p2)   ;;  %vm372_vm2 = vcmask (!%p239_p2), 261120  }
   0x7   : > { %566 = vmatpush3.bf16.msra.mxu0 (!%p239_p2), %v595_v0  ;;  %567 = vmatprep.mubr.msk.bf16.mxu0 (!%p239_p2), %vm608_vm0, %v607_v1  ;;  %v546_v7 = vld [vmem:[%s700_s2] ss:$0 sm:$0xff] (!%p239_p2) }
   0x8   : > { %575 = vmatprep.mubr.msk.bf16.mxu1 (!%p239_p2), %vm608_vm0, %v607_v1  ;;  %579 = vmatprep.subr.bf16.mxu0 (!%p239_p2), %v607_v1  ;;  %v598_v17 = vld [vmem:[%s703_s5] sm:$0xff] (!%p239_p2)  }
   0x9   : > { %572 = vmatpush3.bf16.msra.mxu1 (!%p239_p2), %v596_v5  ;;  %v549_v18 = vld [vmem:[%s702_s4] ss:$0 sm:$0xff] (!%p239_p2) }
   0xa   : > { %573 = vmatprep.subr.bf16.mxu1 (!%p239_p2), %v607_v1  ;;  %v553_v28 = vld [vmem:[%s704_s6] ss:$0 sm:$0xff] (!%p239_p2) }
   0xd   : > { %s707_s28 = smov (!%p271_p3, %s542_s28), 5  ;;  %574 = vmatpush3.bf16.msra.mxu1 %v597_v6 }
   0xe   : > { %s543_s29 = sshll.u32 %s707_s28, 3 }
   0xf   : > { %s274_s9 = scalar_lea.vmem %s698_s0, %s543_s29  ;;  %s280_s25 = scalar_lea.vmem %s705_s7, %s543_s29 }
  0x10   : > { %v283_v2 = vld [vmem:[%s274_s9] sm:$0xff]  ;;  %v284_v3 = vld [vmem:[%s274_s9 + $0x8] sm:$0xff] }
  0x11   : > { %v285_v4 = vpack.c.bf16 %v284_v3, %v283_v2 }
  0x13   : > { %568 = vmatmul.mubr.msk.bf16.vlgmr.msra.gmra.mrb[0].mxu0 %vm301_vm1, %v285_v4 }
  0x14   : > { %581 = vmatprep.mubr.msk.bf16.mxu0 %vm608_vm0, %v607_v1  ;;  %580 = vmatpush3.bf16.msra.mxu0 %v598_v17 }
  0xe6   : > { %v339_v8 = vpop.f32.mrb[0].mxu0 }
  0xe7   : > { %v340_v9 = vadd.f32 %v546_v7, %v339_v8  ;;  %v569_v10 = vpop.f32.mrb[1].mxu0 }
  0xe8   : > { %v342_v11 = vpop.f32.mrb[2].mxu0 }
  0xe9   : > { %v343_v12 = vadd.f32 %v546_v7, %v342_v11  ;;  %v570_v13 = vpop.f32.mrb[3].mxu0  ;;  %v346_v14 = vmax.f32 %v340_v9, 0.0 }
  0xeb   : > { %v347_v15 = vmax.f32 %v343_v12, 0.0 }
  0xed   : > { %v348_v16 = vpack.c.bf16 %v347_v15, %v346_v14 }
  0xef   : > { %576 = vmatmul.mubr.msk.bf16.vlgmr.msra.gmra.mrb[0].mxu1 %vm372_vm2, %v348_v16 }
 0x1c2   : > { %v410_v19 = vpop.f32.mrb[0].mxu1 }
 0x1c3   : > { %v411_v20 = vadd.f32 %v549_v18, %v410_v19  ;;  %v577_v21 = vpop.f32.mrb[1].mxu1 }
 0x1c4   : > { %v413_v22 = vpop.f32.mrb[2].mxu1 }
 0x1c5   : > { %v414_v23 = vadd.f32 %v549_v18, %v413_v22  ;;  %v578_v24 = vpop.f32.mrb[3].mxu1  ;;  %v417_v25 = vmax.f32 %v411_v20, 0.0 }
 0x1c7   : > { %v418_v26 = vmax.f32 %v414_v23, 0.0 }
 0x1c9   : > { %v419_v27 = vpack.c.bf16 %v418_v26, %v417_v25 }
 0x1cb   : > { %582 = vmatmul.mubr.msk.bf16.vlgmr.msra.gmra.mrb[4].mxu0 %vm301_vm1, %v419_v27 }
 0x29e   : > { %v472_v29 = vpop.f32.mrb[4].mxu0 }
 0x29f   : > { %v473_v30 = vadd.f32 %v553_v28, %v472_v29  ;;  %v583_v31 = vpop.f32.mrb[5].mxu0 }
 0x2a0   : > { %v475_v32 = vpop.f32.mrb[6].mxu0 }
 0x2a1   : > { %479 = vst.msk [vmem:[%s280_s25] sm:$0xff] %vm301_vm1, %v473_v30  ;;  %v476_v33 = vadd.f32 %v553_v28, %v475_v32  ;;  %v584_v34 = vpop.f32.mrb[7].mxu0 }
 0x2a3   : > { %480 = vst.msk [vmem:[%s280_s25 + $0x8] sm:$0xff] %vm301_vm1, %v476_v33 }
 0x2a4 PF: > { %s17_s24 = sadd.s32 1, %s605_s24  }
 0x2a5   : > { %p14_p4 = scmp.ge.s32.totalorder %s17_s24, 5  }
 0x2a7   :  { %16 = sbr.rel (!%p14_p4) target bundleno = 1 (0x1), region = 78 }

</bundles_post_ra>
